<compile_context>
chip_gen: v7x
topology: tpu7x:2x2x1
jax: 0.10.0
libtpu: 0.0.40
codegen_flags: <defaults>
</compile_context>

<pallas_src>
import functools

import jax
import jax.numpy as jnp
from jax.experimental import pallas as pl
from jax.experimental.pallas import tpu as pltpu

F32_EPS = float(jnp.finfo(jnp.float32).eps)
_COL_CHOICES = (1024, 512, 256, 128)   # lane-dense widths (multiples of 128)
_PAD_COLS = 1024                       # fallback width for ragged sizes


# -------------------------------------------------------- generation tuning ---
def _tpu_generation():
    try:
        kind = jax.devices()[0].device_kind.lower()
    except Exception:
        return 0
    for g in (7, 6, 5):
        if ("v%d" % g) in kind:
            return g
    return 0


_GEN = _tpu_generation()
if _GEN >= 7:
    _BLOCK_BYTES = 8 << 20     # 8 MiB streaming blocks (HBM ~3.2 TB/s, step overhead <10%)
    _FUSED_BYTES = 8 << 20     # unpipelined fused path: keep modest on v7x
    _VMEM_LIMIT = 48 << 20     # 64 MiB physical VMEM per TC on v7x
elif _GEN == 6:
    _BLOCK_BYTES = 4 << 20     # ~86% of HBM roofline at 4 MiB tiles on v6e
    _FUSED_BYTES = 16 << 20
    _VMEM_LIMIT = 80 << 20     # 128 MiB physical
elif _GEN == 5:
    _BLOCK_BYTES = 2 << 20     # v5e: small scoped default, single vst slot
    _FUSED_BYTES = 16 << 20
    _VMEM_LIMIT = 80 << 20
else:
    _BLOCK_BYTES = 2 << 20     # unknown chip: conservative, keep compiler defaults
    _FUSED_BYTES = 2 << 20
    _VMEM_LIMIT = None


def _compiler_params(dimension_semantics):
    if _VMEM_LIMIT is None:
        return pltpu.CompilerParams(dimension_semantics=dimension_semantics)
    return pltpu.CompilerParams(dimension_semantics=dimension_semantics,
                                vmem_limit_bytes=_VMEM_LIMIT)


# ---------------------------------------------------------------- kernels ---
def _valid_mask(shape, row_offset, n_valid, cols):
    """Mask of in-range elements for a (rows, cols) block.

    n_valid is static.  Compares row indices against the single ragged row
    (no global rid*cols+cid product, so no int32 overflow for huge tensors).
    """
    full_rows = n_valid // cols
    rem = n_valid % cols
    rid = jax.lax.broadcasted_iota(jnp.int32, shape, 0) + row_offset
    if rem == 0:
        return rid < full_rows
    cid = jax.lax.broadcasted_iota(jnp.int32, shape, 1)
    return (rid < full_rows) | ((rid == full_rows) & (cid < rem))


def _observer_kernel(x_ref, pmin_ref, pmax_ref, *, n_valid, block_rows, cols,
                     needs_mask):
    """Per-block partial min/max to a small (8, cols) output (parallel grid).

    The block is tree-reduced across vregs (reshape to (-1, 8, cols), min/max
    over axis 0 — pure VPU elementwise), so there is no full-block scratch
    accumulator and no serialization across grid steps.
    """
    x = x_ref[...].astype(jnp.float32)

    def emit_partial(xmn, xmx):
        if block_rows % 8 == 0:
            g = block_rows // 8
            pmin_ref[0] = jnp.min(xmn.reshape(g, 8, cols), axis=0)
            pmax_ref[0] = jnp.max(xmx.reshape(g, 8, cols), axis=0)
        else:
            # tiny / ragged-row single-block case: scalar reduce, broadcast out.
            pmin_ref[0] = jnp.broadcast_to(jnp.min(xmn), (8, cols))
            pmax_ref[0] = jnp.broadcast_to(jnp.max(xmx), (8, cols))

    if not needs_mask:                       # trace-time: every element valid
        emit_partial(x, x)
    else:
        i = pl.program_id(0)
        is_last = i == pl.num_programs(0) - 1

        @pl.when(jnp.logical_not(is_last))   # non-final blocks: no mask work
        def _():
            emit_partial(x, x)

        @pl.when(is_last)                    # only the final block pays for the mask
        def _():
            valid = _valid_mask(x.shape, i * block_rows, n_valid, cols)
            emit_partial(jnp.where(valid, x, jnp.float32(jnp.inf)),
                         jnp.where(valid, x, jnp.float32(-jnp.inf)))


def _fake_quant_kernel(qp_ref, x_ref, o_ref):
    """Elementwise quantize-dequantize.

    qp_ref (SMEM f32[4]) = [scale, 1/scale, qmin - zp, qmax - zp].
    zero_point is folded into the clamp bounds (exact since zp is integer).
    """
    x = x_ref[...].astype(jnp.float32)
    scale = qp_ref[0]
    inv_scale = qp_ref[1]
    lo = qp_ref[2]
    hi = qp_ref[3]
    q = jnp.clip(jnp.round(x * inv_scale), lo, hi)
    o_ref[...] = (q * scale).astype(o_ref.dtype)


def _fused_kernel(state_ref, x_ref, y_ref, stats_ref, *, n_valid, qmin, qmax, cols):
    """Single-block observer + qparams + fake-quant (one HBM pass, one launch).

    state_ref (SMEM f32[2]) = [running_min, running_max]
    stats_ref (SMEM f32[5]) = [new_min, new_max, scale, zero_point, inv_scale]
    """
    x = x_ref[...].astype(jnp.float32)
    if n_valid == x.size:                    # trace-time branch (no tail)
        new_min = jnp.minimum(state_ref[0], jnp.min(x))
        new_max = jnp.maximum(state_ref[1], jnp.max(x))
    else:
        valid = _valid_mask(x.shape, 0, n_valid, cols)
        new_min = jnp.minimum(state_ref[0],
                              jnp.min(jnp.where(valid, x, jnp.float32(jnp.inf))))
        new_max = jnp.maximum(state_ref[1],
                              jnp.max(jnp.where(valid, x, jnp.float32(-jnp.inf))))

    # affine uint8 qparams (MinMax-observer semantics, range clamped to include 0)
    mn0 = jnp.minimum(new_min, 0.0)
    mx0 = jnp.maximum(new_max, 0.0)
    scale = jnp.maximum((mx0 - mn0) / float(qmax - qmin), jnp.float32(F32_EPS))
    zp = jnp.clip(float(qmin) - jnp.round(mn0 / scale), float(qmin), float(qmax))
    inv_scale = 1.0 / scale
    lo = float(qmin) - zp
    hi = float(qmax) - zp

    # NOTE: x*inv_scale can differ from x/scale by 1 ulp (may flip ties at .5);
    # acceptable for fake-quant and consistent with the host-side reference.
    q = jnp.clip(jnp.round(x * inv_scale), lo, hi)
    y_ref[...] = (q * scale).astype(y_ref.dtype)

    stats_ref[0] = new_min
    stats_ref[1] = new_max
    stats_ref[2] = scale
    stats_ref[3] = zp
    stats_ref[4] = inv_scale


# --------------------------------------------------------------- wrappers ---
def _to_lane_dense(x):
    """Flatten to a lane-dense (rows, cols) view; free when numel % 128 == 0."""
    flat = jnp.reshape(x, (-1,))
    n = flat.shape[0]
    for cols in _COL_CHOICES:
        if n >= cols and n % cols == 0:
            return flat.reshape(n // cols, cols), n, cols
    # TODO(synk): ragged sizes take one pad copy here (and a slice on the way
    # out); pad values are masked / discarded in-kernel.
    cols = _PAD_COLS
    rows = pl.cdiv(n, cols)
    flat = jnp.pad(flat, (0, rows * cols - n))
    return flat.reshape(rows, cols), n, cols


def _from_lane_dense(y2d, n, shape):
    y = y2d.reshape(-1)
    if y.shape[0] != n:
        y = y[:n]
    return y.reshape(shape)


def _row_tiling(rows, cols):
    """(block_rows, grid): per-generation block bytes, full extent when it fits."""
    block_rows = max(8, (_BLOCK_BYTES // (cols * 4)) // 8 * 8)
    if rows <= block_rows:
        return rows, 1
    return block_rows, pl.cdiv(rows, block_rows)


def observe_min_max(x2d, n_valid):
    rows, cols = x2d.shape
    block_rows, grid = _row_tiling(rows, cols)
    needs_mask = (grid * block_rows * cols) != n_valid
    pmin, pmax = pl.pallas_call(
        functools.partial(_observer_kernel, n_valid=n_valid,
                          block_rows=block_rows, cols=cols, needs_mask=needs_mask),
        out_shape=(jax.ShapeDtypeStruct((grid, 8, cols), jnp.float32),
                   jax.ShapeDtypeStruct((grid, 8, cols), jnp.float32)),
        grid=(grid,),
        in_specs=[pl.BlockSpec((block_rows, cols), lambda i: (i, 0))],
        out_specs=(pl.BlockSpec((1, 8, cols), lambda i: (i, 0, 0)),
                   pl.BlockSpec((1, 8, cols), lambda i: (i, 0, 0))),
        compiler_params=_compiler_params(("parallel",)),
    )(x2d)
    # Tiny follow-up reduce over the (grid, 8, cols) partials.
    return jnp.min(pmin), jnp.max(pmax)


def apply_fake_quant(x2d, scale, inv_scale, zero_point, qmin, qmax):
    rows, cols = x2d.shape
    block_rows, grid = _row_tiling(rows, cols)
    lo = jnp.float32(qmin) - zero_point
    hi = jnp.float32(qmax) - zero_point
    qp = jnp.stack([scale, inv_scale, lo, hi]).astype(jnp.float32)
    return pl.pallas_call(
        _fake_quant_kernel,
        out_shape=jax.ShapeDtypeStruct(x2d.shape, x2d.dtype),
        grid=(grid,),
        in_specs=[pl.BlockSpec(memory_space=pltpu.MemorySpace.SMEM),
                  pl.BlockSpec((block_rows, cols), lambda i: (i, 0))],
        out_specs=pl.BlockSpec((block_rows, cols), lambda i: (i, 0)),
        compiler_params=_compiler_params(("parallel",)),
    )(qp, x2d)


def fused_observe_fake_quant(x2d, n_valid, run_min, run_max, qmin, qmax):
    rows, cols = x2d.shape
    state = jnp.stack([run_min, run_max]).astype(jnp.float32)
    y2d, stats = pl.pallas_call(
        functools.partial(_fused_kernel, n_valid=n_valid, qmin=qmin,
                          qmax=qmax, cols=cols),
        out_shape=(jax.ShapeDtypeStruct(x2d.shape, x2d.dtype),
                   jax.ShapeDtypeStruct((5,), jnp.float32)),
        grid=(1,),
        in_specs=[pl.BlockSpec(memory_space=pltpu.MemorySpace.SMEM),
                  pl.BlockSpec((rows, cols), lambda i: (0, 0))],
        out_specs=(pl.BlockSpec((rows, cols), lambda i: (0, 0)),
                   pl.BlockSpec(memory_space=pltpu.MemorySpace.SMEM)),
        compiler_params=_compiler_params(("arbitrary",)),
    )(state, x2d)
    return y2d, stats


# ----------------------------------------------------------------- module ---
class LptBaseJax:
    """JAX/Pallas mirror of LptBase: flag buffers + MinMax fake-quant forward."""

    def __init__(self, quant_min=0, quant_max=255):
        # Python-bool flags (no per-call device->host sync) plus uint8 mirror
        # buffers matching the torch register_buffer semantics.
        self._fake_quant_on = True
        self._observer_on = True
        self.fake_quant_enabled = jnp.array([1], dtype=jnp.uint8)
        self.observer_enabled = jnp.array([1], dtype=jnp.uint8)
        self.quant_min = int(quant_min)
        self.quant_max = int(quant_max)
        # observer / qparam state
        self.min_val = jnp.float32(jnp.inf)
        self.max_val = jnp.float32(-jnp.inf)
        self.scale = jnp.float32(1.0)
        self.zero_point = jnp.float32(0.0)
        self.inv_scale = jnp.float32(1.0)

    # --- torch.jit.export-style flag helpers --------------------------------
    def enable_fake_quant(self, enabled: bool = True):
        self._fake_quant_on = bool(enabled)
        self.fake_quant_enabled = jnp.array([1 if enabled else 0], jnp.uint8)

    def disable_fake_quant(self):
        self.enable_fake_quant(False)

    def enable_observer(self, enabled: bool = True):
        self._observer_on = bool(enabled)
        self.observer_enabled = jnp.array([1 if enabled else 0], jnp.uint8)

    def disable_observer(self):
        self.enable_observer(False)

    # --- qparams (MinMax-observer style, affine uint8) ----------------------
    def calculate_qparams(self):
        mn = jnp.minimum(self.min_val, 0.0)
        mx = jnp.maximum(self.max_val, 0.0)
        scale = (mx - mn) / float(self.quant_max - self.quant_min)
        scale = jnp.maximum(scale, jnp.float32(F32_EPS))
        zero_point = jnp.clip(self.quant_min - jnp.round(mn / scale),
                              self.quant_min, self.quant_max)
        return scale.astype(jnp.float32), zero_point.astype(jnp.float32)

    # --- forward -------------------------------------------------------------
    def __call__(self, x):
        observer_on = self._observer_on
        fq_on = self._fake_quant_on
        if not observer_on and not fq_on:
            return x

        x2d, n, cols = _to_lane_dense(x)
        rows = x2d.shape[0]

        # Fused single-block path: one HBM pass + one launch for small tensors.
        if observer_on and fq_on and rows * cols * 4 <= _FUSED_BYTES:
            y2d, stats = fused_observe_fake_quant(
                x2d, n, self.min_val, self.max_val, self.quant_min, self.quant_max)
            self.min_val, self.max_val = stats[0], stats[1]
            self.scale, self.zero_point, self.inv_scale = stats[2], stats[3], stats[4]
            return _from_lane_dense(y2d, n, x.shape)

        if observer_on:
            mn, mx = observe_min_max(x2d, n)
            self.min_val = jnp.minimum(self.min_val, mn)
            self.max_val = jnp.maximum(self.max_val, mx)
            self.scale, self.zero_point = self.calculate_qparams()
            self.inv_scale = (jnp.float32(1.0) / self.scale).astype(jnp.float32)

        if not fq_on:
            return x

        y2d = apply_fake_quant(x2d, self.scale, self.inv_scale, self.zero_point,
                               self.quant_min, self.quant_max)
        return _from_lane_dense(y2d, n, x.shape)


# ------------------------------------------------------------------- main ---
def _reference(mod, x):
    """Plain-JAX reference using the module's stored qparams (same formula)."""
    xf = x.reshape(-1).astype(jnp.float32)
    q = jnp.clip(jnp.round(xf * mod.inv_scale) + mod.zero_point,
                 mod.quant_min, mod.quant_max)
    y = (q - mod.zero_point) * mod.scale
    return y.reshape(x.shape).astype(x.dtype)


if __name__ == "__main__":
    key = jax.random.PRNGKey(0)
    k1, k2, k3 = jax.random.split(key, 3)

    # 1) small NCHW conv activation -> fused single-block path
    x1 = jax.random.normal(k1, (2, 4, 16, 16), dtype=jnp.float32) * 3.0
    m1 = LptBaseJax(quant_min=0, quant_max=255)
    y1 = jax.block_until_ready(m1(x1))
    assert y1.shape == x1.shape and y1.dtype == x1.dtype
    assert jnp.allclose(m1.min_val, x1.min()) and jnp.allclose(m1.max_val, x1.max())
    assert jnp.allclose(y1, _reference(m1, x1), atol=1e-5, rtol=1e-5)

    # fake-quant disabled path = identity; exercises the standalone observer
    # kernel (grid=1, tiny block -> scalar-broadcast partial fallback)
    m1.disable_fake_quant()
    y1b = jax.block_until_ready(m1(x1))
    assert jnp.allclose(y1b, x1)
    assert jnp.allclose(m1.min_val, x1.min()) and jnp.allclose(m1.max_val, x1.max())

    # 2) odd element count (not a multiple of 128) -> masked tail, fused path
    x2 = jax.random.normal(k2, (3, 5, 7, 11), dtype=jnp.float32) * 2.0 + 1.0
    m2 = LptBaseJax()
    y2 = jax.block_until_ready(m2(x2))
    assert y2.shape == x2.shape
    assert jnp.allclose(m2.min_val, x2.min()) and jnp.allclose(m2.max_val, x2.max())
    assert jnp.allclose(y2, _reference(m2, x2), atol=1e-5, rtol=1e-5)

    # 3) larger activation (32 MiB) -> tiled parallel-partials observer (grid>1)
    #    followed by the tiled fake-quant kernel
    x3 = jax.random.normal(k3, (16, 32, 128, 128), dtype=jnp.float32) * 5.0
    m3 = LptBaseJax()
    y3 = jax.block_until_ready(m3(x3))
    assert jnp.allclose(m3.min_val, x3.min()) and jnp.allclose(m3.max_val, x3.max())
    assert jnp.allclose(y3, _reference(m3, x3), atol=1e-5, rtol=1e-5)

    # observer disabled -> fake-quant-only tiled kernel with stored qparams
    m3.disable_observer()
    y3b = jax.block_until_ready(m3(x3))
    assert jnp.allclose(y3b, y3, atol=1e-5, rtol=1e-5)

    # both disabled -> pure identity, no kernels launched
    m3.disable_fake_quant()
    assert m3(x3) is x3

    print("KERNEL_OK")
</pallas_src>

<mosaic_0001>
module attributes {stable_mosaic.version = 11 : i64} {
  func.func @_fused_kernel(%arg0: i32, %arg1: memref<2xf32, #tpu.memory_space<smem>>, %arg2: memref<2x1024xf32, #tpu.memory_space<vmem>>, %arg3: memref<2x1024xf32, #tpu.memory_space<vmem>>, %arg4: memref<5xf32, #tpu.memory_space<smem>>) attributes {dimension_semantics = [#tpu.dimension_semantics<arbitrary>], iteration_bounds = array<i64: 1>, scalar_prefetch = 0 : i64, scratch_operands = 0 : i64, tpu.core_type = #tpu.core_type<tc>, window_params = [{transform_indices = @transform_0, window_bounds = array<i64: 2>}, {pipeline_mode = #tpu.pipeline_mode<synchronous>, transform_indices = @transform_1, window_bounds = array<i64: 2, 1024>}, {pipeline_mode = #tpu.pipeline_mode<synchronous>, transform_indices = @transform_2, window_bounds = array<i64: 2, 1024>}, {transform_indices = @transform_3, window_bounds = array<i64: 5>}]} {
    %c0 = arith.constant 0 : index
    %c0_0 = arith.constant 0 : index
    %0 = vector.load %arg2[%c0, %c0_0] : memref<2x1024xf32, #tpu.memory_space<vmem>>, vector<2x1024xf32>
    %c0_1 = arith.constant 0 : index
    %1 = memref.load %arg1[%c0_1] : memref<2xf32, #tpu.memory_space<smem>>
    %2 = vector.shape_cast %0 : vector<2x1024xf32> to vector<1x2x1024xf32>
    %cst = arith.constant dense<0x7F800000> : vector<1xf32>
    %3 = vector.multi_reduction <minimumf>, %2, %cst [1, 2] : vector<1x2x1024xf32> to vector<1xf32>
    %4 = vector.shape_cast %3 : vector<1xf32> to vector<1x1x1xf32>
    %5 = vector.extract %4[0, 0, 0] : f32 from vector<1x1x1xf32>
    %6 = arith.minimumf %1, %5 : f32
    %c1 = arith.constant 1 : index
    %7 = memref.load %arg1[%c1] : memref<2xf32, #tpu.memory_space<smem>>
    %8 = vector.shape_cast %0 : vector<2x1024xf32> to vector<1x2x1024xf32>
    %cst_2 = arith.constant dense<0xFF800000> : vector<1xf32>
    %9 = vector.multi_reduction <maximumf>, %8, %cst_2 [1, 2] : vector<1x2x1024xf32> to vector<1xf32>
    %10 = vector.shape_cast %9 : vector<1xf32> to vector<1x1x1xf32>
    %11 = vector.extract %10[0, 0, 0] : f32 from vector<1x1x1xf32>
    %12 = arith.maximumf %7, %11 : f32
    %cst_3 = arith.constant 0.000000e+00 : f32
    %13 = arith.minimumf %6, %cst_3 : f32
    %cst_4 = arith.constant 0.000000e+00 : f32
    %14 = arith.maximumf %12, %cst_4 : f32
    %15 = arith.subf %14, %13 : f32
    %cst_5 = arith.constant 2.550000e+02 : f32
    %16 = arith.divf %15, %cst_5 : f32
    %cst_6 = arith.constant 1.1920929E-7 : f32
    %17 = arith.maximumf %16, %cst_6 : f32
    %18 = arith.divf %13, %17 : f32
    %19 = math.roundeven %18 : f32
    %cst_7 = arith.constant 0.000000e+00 : f32
    %20 = arith.subf %cst_7, %19 : f32
    %cst_8 = arith.constant 0.000000e+00 : f32
    %cst_9 = arith.constant 2.550000e+02 : f32
    %21 = arith.maximumf %cst_8, %20 : f32
    %22 = arith.minimumf %cst_9, %21 : f32
    %cst_10 = arith.constant 1.000000e+00 : f32
    %23 = arith.divf %cst_10, %17 : f32
    %cst_11 = arith.constant 0.000000e+00 : f32
    %24 = arith.subf %cst_11, %22 : f32
    %cst_12 = arith.constant 2.550000e+02 : f32
    %25 = arith.subf %cst_12, %22 : f32
    %26 = vector.broadcast %23 : f32 to vector<2x1024xf32>
    %27 = arith.mulf %0, %26 : vector<2x1024xf32>
    %28 = math.roundeven %27 : vector<2x1024xf32>
    %29 = vector.broadcast %24 : f32 to vector<2x1024xf32>
    %30 = arith.maximumf %29, %28 : vector<2x1024xf32>
    %31 = vector.broadcast %25 : f32 to vector<2x1024xf32>
    %32 = arith.minimumf %31, %30 : vector<2x1024xf32>
    %33 = vector.broadcast %17 : f32 to vector<2x1024xf32>
    %34 = arith.mulf %32, %33 : vector<2x1024xf32>
    %c0_13 = arith.constant 0 : index
    %c0_14 = arith.constant 0 : index
    %35 = vector.load %arg3[%c0_13, %c0_14] : memref<2x1024xf32, #tpu.memory_space<vmem>>, vector<2x1024xf32>
    tpu.vector_store %arg3[%c0_13, %c0_14], %34 {strides = array<i32>} : memref<2x1024xf32, #tpu.memory_space<vmem>>, vector<2x1024xf32>,
    %c0_15 = arith.constant 0 : index
    %36 = memref.load %arg4[%c0_15] : memref<5xf32, #tpu.memory_space<smem>>
    memref.store %6, %arg4[%c0_15] : memref<5xf32, #tpu.memory_space<smem>>
    %c1_16 = arith.constant 1 : index
    %37 = memref.load %arg4[%c1_16] : memref<5xf32, #tpu.memory_space<smem>>
    memref.store %12, %arg4[%c1_16] : memref<5xf32, #tpu.memory_space<smem>>
    %c2 = arith.constant 2 : index
    %38 = memref.load %arg4[%c2] : memref<5xf32, #tpu.memory_space<smem>>
    memref.store %17, %arg4[%c2] : memref<5xf32, #tpu.memory_space<smem>>
    %c3 = arith.constant 3 : index
    %39 = memref.load %arg4[%c3] : memref<5xf32, #tpu.memory_space<smem>>
    memref.store %22, %arg4[%c3] : memref<5xf32, #tpu.memory_space<smem>>
    %c4 = arith.constant 4 : index
    %40 = memref.load %arg4[%c4] : memref<5xf32, #tpu.memory_space<smem>>
    memref.store %23, %arg4[%c4] : memref<5xf32, #tpu.memory_space<smem>>
    return
  }
  func.func @transform_0(%arg0: i32) -> i32 {
    %c0_i32 = arith.constant 0 : i32
    %c0_i32_0 = arith.constant 0 : i32
    return %c0_i32 : i32
  }
  func.func @transform_1(%arg0: i32) -> (i32, i32) {
    %c0_i32 = arith.constant 0 : i32
    %c0_i32_0 = arith.constant 0 : i32
    %c0_i32_1 = arith.constant 0 : i32
    return %c0_i32, %c0_i32_0 : i32, i32
  }
  func.func @transform_2(%arg0: i32) -> (i32, i32) {
    %c0_i32 = arith.constant 0 : i32
    %c0_i32_0 = arith.constant 0 : i32
    %c0_i32_1 = arith.constant 0 : i32
    return %c0_i32, %c0_i32_0 : i32, i32
  }
  func.func @transform_3(%arg0: i32) -> i32 {
    %c0_i32 = arith.constant 0 : i32
    %c0_i32_0 = arith.constant 0 : i32
    return %c0_i32 : i32
  }
}

</mosaic_0001>

<bundles_post_ra>
// kernel: tpu_custom_call.1
= control target key start
LH: loop header
LB: loop body
LE: loop exit
PB: predicated region body
PF: predicated region fallthrough
CT: control target
= control target key end

     0   :  { %9 = vsyncpa [#allocation5], 0  ;;  %s419_s0 = inlined_call_operand.hbm [shape: f32[2], index: 0, kind: input, shape index: {}]   ;;  %s420_s1 = inlined_call_operand.hbm [shape: f32[2,1024], index: 1, kind: input, shape index: {}]   ;;  %s421_s2 = inlined_call_operand.hbm [shape: f32[2,1024], index: 2, kind: output, shape index: {0}]   ;;  %s422_s3 = inlined_call_operand.hbm [shape: f32[5], index: 3, kind: output, shape index: {1}]  }
   0x1   :  { %10 = vsyncpa [#allocation3], 0 }
   0x2   :  { %11 = vsyncpa [#allocation4], 0 }
   0x3   :  { %12 = vsyncpa [#allocation6], 0  ;;  %s240_s14 = scalar_lea.hbm %s419_s0, 16 }
   0x4   :  { %p241_p0 = scmp.ne.s32.totalorder %s419_s0, %s240_s14  ;;  %p244_p1 = scmp.lt.u32.totalorder %s240_s14, %s419_s0 }
   0x6   :  { %p246_p2 = pnand %p244_p1, %p241_p0 }
   0x8   :  { %249 = shalt.err (!%p246_p2)
}
   0x9   :  { %s312_s19 = smov [#allocation2]   ;;  %s313_s22 = smov [#allocation7]  }
   0xa   :  { %20 = dma.hbm_to_smem %s419_s0, 16, %s312_s19, [#allocation5]  }
   0xb   :  { %s27_s23 = sshll.u32 %s313_s22, 4  ;;  %s250_s26 = scalar_lea.hbm %s420_s1, 256  ;;  %s28_s23 = int_to_ptr.vmem [resolvable:$true] %s27_s23 }
   0xc   :  { %p251_p3 = scmp.ne.s32.totalorder %s420_s1, %s250_s26  ;;  %p254_p4 = scmp.lt.u32.totalorder %s250_s26, %s420_s1 }
   0xe   :  { %p256_p5 = pnand %p254_p4, %p251_p3 }
  0x10   :  { %259 = shalt.err (!%p256_p5)
}
  0x11   :  { %s260_s4 = scalar_lea.vmem %s28_s23, 256  ;;  %p265_p7 = scmp.lt.s32.totalorder %s28_s23, %s28_s23 }
  0x12   :  { %p261_p6 = scmp.ne.s32.totalorder %s28_s23, %s260_s4  ;;  %p266_p8 = scmp.lt.s32.totalorder %s260_s4, %s260_s4 }
  0x14   :  { %p267_p9 = por %p266_p8, %p265_p7 }
  0x16   :  { %p268_p10 = pnand %p267_p9, %p261_p6 }
  0x18   :  { %271 = shalt.err (!%p268_p10)
}
  0x19   :  { %30 = dma.hbm_to_vmem [thread:$0]  %s420_s1, 256, %s28_s23, [#allocation3]  }
  0x1a   :  { %304 = dma.done.wait [#allocation5], 16  }
  0x1b   :  { %305 = vsyncadd [#allocation5], 4294967280 }
  0x1c   :  { %306 = dma.done.wait [#allocation3], 256  }
  0x1d   :  { %307 = vsyncadd [#allocation3], 4294967040 }
  0x1e   :  { %37 = sfence }
  0x1f   :  { %v364_v0 = vld [vmem:[#allocation7] sm:$0xff]  ;;  %v366_v1 = vld [vmem:[#allocation7 + $0x8] sm:$0xff]  ;;  %v47_v2 = vlaneseq  ;;  %v314_v3 = vmov 1983009808   ;;  %vm85_vm0 = vcmask 1041408   ;;  %s40_s1 = sld [smem:[#allocation2]] }
  0x20   :  { %v45_v4 = vunpack.c.l.s4 %v314_v3  ;;  %v43_v6 = vcombine.high %v364_v0, %v364_v0  ;;  %v60_v8 = vcombine.high %v366_v1, %v366_v1  ;;  %s219_s6 = sld [smem:[#allocation2 + $0x1]]  ;;  %s315_s10 = smov 0.0  }
  0x21   :  { %v48_v5 = vshrl.u32 %v47_v2, 7  ;;  %s316_s16 = smov 1.1920929e-07   ;;  %s317_s28 = smov 255.0  }
  0x22   :  { %v46_v7 = vunpack.c.0.s8 %v45_v4 }
  0x24   :  { %v49_v9 = vsub.s32 %v46_v7, %v48_v5 }
  0x26   :  { %v50_v10 = vrot.slane %v364_v0, %v49_v9  ;;  %v57_v11 = vrot.slane %v43_v6, %v49_v9  ;;  %v67_v12 = vrot.slane %v366_v1, %v49_v9  ;;  %v74_v13 = vrot.slane %v60_v8, %v49_v9 }
  0x28   :  { %v58_v14 = vcombine.high %v50_v10, %v50_v10  ;;  %v59_v15 = vcombine.high %v57_v11, %v57_v11  ;;  %v75_v16 = vcombine.high %v67_v12, %v67_v12  ;;  %v76_v17 = vcombine.high %v74_v13, %v74_v13 }
  0x29   :  { %v86_v18 = vsel %vm85_vm0, %v50_v10, inf  ;;  %v88_v19 = vsel %vm85_vm0, %v57_v11, inf  ;;  %v90_v20 = vsel %vm85_vm0, %v67_v12, inf  ;;  %v94_v21 = vsel %vm85_vm0, %v74_v13, inf }
  0x2a   :  { %v87_v22 = vsel %vm85_vm0, %v58_v14, inf  ;;  %v89_v23 = vsel %vm85_vm0, %v59_v15, inf  ;;  %v91_v24 = vmin.f32 %v86_v18, %v90_v20  ;;  %v92_v25 = vsel %vm85_vm0, %v75_v16, inf }
  0x2b   :  { %v93_v26 = vmin.f32 %v87_v22, %v92_v25  ;;  %v95_v27 = vmin.f32 %v88_v19, %v94_v21  ;;  %v96_v28 = vsel %vm85_vm0, %v76_v17, inf  ;;  %v112_v29 = vsel %vm85_vm0, %v50_v10, -inf }
  0x2c   :  { %v97_v30 = vmin.f32 %v89_v23, %v96_v28  ;;  %v113_v31 = vsel %vm85_vm0, %v58_v14, -inf  ;;  %v114_v32 = vsel %vm85_vm0, %v57_v11, -inf  ;;  %v115_v33 = vsel %vm85_vm0, %v59_v15, -inf }
  0x2d   :  { %v98_v34 = vmin.f32 %v91_v24, %v93_v26  ;;  %v116_v35 = vsel %vm85_vm0, %v67_v12, -inf  ;;  %v118_v36 = vsel %vm85_vm0, %v75_v16, -inf  ;;  %v120_v37 = vsel %vm85_vm0, %v74_v13, -inf }
  0x2e   :  { %v99_v38 = vmin.f32 %v95_v27, %v97_v30  ;;  %v117_v39 = vmax.f32 %v112_v29, %v116_v35  ;;  %v119_v40 = vmax.f32 %v113_v31, %v118_v36  ;;  %v121_v41 = vmax.f32 %v114_v32, %v120_v37 }
  0x2f   :  { %v122_v42 = vsel %vm85_vm0, %v76_v17, -inf }
  0x30   :  { %v100_v43 = vmin.f32 %v98_v34, %v99_v38  ;;  %v123_v44 = vmax.f32 %v115_v33, %v122_v42  ;;  %v124_v45 = vmax.f32 %v117_v39, %v119_v40 }
  0x32   :  { %101 = vmin.xlane.f32.xlu0 %v100_v43  ;;  %v125_v46 = vmax.f32 %v121_v41, %v123_v44 }
  0x34   :  { %v126_v47 = vmax.f32 %v124_v45, %v125_v46 }
  0x36   :  { %127 = vmax.xlane.f32.xlu0 %v126_v47 }
  0xbf   :  { %v102_v48 = vpop.xlane.xlu0 %101 }
  0xc0   :  { %v103_v49 = vrot.slane %v102_v48, 4 }
  0xc2   :  { %v104_v50 = vmin.f32 %v102_v48, %v103_v49 }
  0xc3   :  { %v128_v51 = vpop.xlane.xlu0 %127 }
  0xc4   :  { %v105_v52 = vrot.slane %v104_v50, 2  ;;  %v129_v53 = vrot.slane %v128_v51, 4 }
  0xc6   :  { %v130_v54 = vmax.f32 %v128_v51, %v129_v53  ;;  %v106_v55 = vmin.f32 %v104_v50, %v105_v52 }
  0xc8   :  { %v131_v56 = vrot.slane %v130_v54, 2  ;;  %v107_v57 = vrot.slane %v106_v55, 1 }
  0xca   :  { %v132_v58 = vmax.f32 %v130_v54, %v131_v56  ;;  %v108_v59 = vmin.f32 %v106_v55, %v107_v57 }
  0xcc   :  { %220 = vpush %v108_v59  ;;  %v133_v60 = vrot.slane %v132_v58, 1 }
  0xce   :  { %v134_v61 = vmax.f32 %v132_v58, %v133_v60 }
  0xd0   :  { %222 = vpush %v134_v61 }
  0xfd   :  { %s221_s7 = spop %220 }
  0xfe   :  { %s110_s8 = smin.f32 %s221_s7, %s40_s1  ;;  %s272_s1 = scalar_lea.hbm %s422_s3, 16 }
  0xff   :  { %181 = sst [smem:[#allocation9]] %s110_s8  ;;  %s137_s11 = smin.f32 %s315_s10, %s110_s8 }
 0x100   :  { %p273_p12 = scmp.ne.s32.totalorder %s422_s3, %s272_s1  ;;  %p276_p13 = scmp.lt.u32.totalorder %s272_s1, %s422_s3 }
 0x101   :  { %s223_s9 = spop %222 }
 0x102   :  { %s136_s12 = smax.f32 %s223_s9, %s219_s6  ;;  %p278_p0 = pnand %p276_p13, %p273_p12 }
 0x103   :  { %s138_s13 = smax.f32 %s315_s10, %s136_s12  ;;  %183 = sst [smem:[#allocation9 + $0x1]] %s136_s12 }
 0x104   :  { %s139_s14 = ssub.f32 %s138_s13, %s137_s11 }
 0x106   :  { %s142_s15 = smul.f32 0.003921569, %s139_s14 }
 0x108   :  { %s143_s17 = smax.f32 %s316_s16, %s142_s15 }
 0x109   :  { %v144_v62 = vstv %s143_s17  ;;  %185 = sst [smem:[#allocation9 + $0x2]] %s143_s17 }
 0x10a   :  { %238 = vrcp.f32 %v144_v62 }
 0x114   :  { %v239_v63 = vpop.eup %238 }
 0x115   :  { %224 = vpush %v239_v63 }
 0x146   :  { %s225_s18 = spop %224 }
 0x147   :  { %s147_s19 = smul.f32 %s225_s18, %s137_s11  ;;  %189 = sst [smem:[#allocation9 + $0x4]] %s225_s18  ;;  %v164_v2 = vstv %s225_s18 }
 0x148   :  { %v165_v3 = vmul.f32 %v164_v2, %v364_v0  ;;  %v166_v4 = vmul.f32 %v164_v2, %v366_v1 }
 0x149   :  { %s148_s20 = scvt.f32.s32 %s147_s19  ;;  %s153_s21 = sand.u32 2147483647, %s147_s19 }
 0x14a   :  { %s151_s23 = sand.u32 2147483648, %s147_s19  ;;  %p154_p11 = scmp.lt.f32.partialorder %s153_s21, 2.1474836e+09  ;;  %v226_v5 = vround.rtne.f32 %v165_v3  ;;  %v227_v6 = vround.rtne.f32 %v166_v4 }
 0x14b   :  { %s149_s22 = scvt.s32.f32 %s148_s20 }
 0x14d   :  { %s150_s24 = sand.u32 2147483647, %s149_s22 }
 0x14e   :  { %s152_s25 = sor.u32 %s151_s23, %s150_s24 }
 0x14f   :  { %s424_s25 = smov (!%p154_p11, %s152_s25), %s147_s19 }
 0x150   :  { %s156_s26 = ssub.f32 0.0, %s424_s25 }
 0x152   :  { %s157_s27 = smax.f32 %s315_s10, %s156_s26 }
 0x153   :  { %s158_s29 = smin.f32 %s317_s28, %s157_s27 }
 0x154   :  { %s162_s30 = ssub.f32 0.0, %s158_s29 }
 0x155   :  { %s163_s4 = ssub.f32 255.0, %s158_s29 }
 0x156   :  { %v169_v7 = vstv %s162_s30  ;;  %187 = sst [smem:[#allocation9 + $0x3]] %s158_s29 }
 0x157   :  { %v170_v8 = vmax.f32 %v169_v7, %v226_v5  ;;  %v171_v9 = vmax.f32 %v169_v7, %v227_v6 }
 0x158   :  { %281 = shalt.err (!%p278_p0)
}
 0x159   :  { %s318_s10 = smov [#allocation9]   ;;  %v172_v0 = vstv %s163_s4  ;;  %s319_s13 = smov [#allocation8]  }
 0x15a   :  { %207 = dma.smem_to_hbm %s318_s10, 16, %s422_s3, [#allocation6]   ;;  %v173_v1 = vmin.f32 %v172_v0, %v170_v8  ;;  %v174_v10 = vmin.f32 %v172_v0, %v171_v9 }
 0x15b   :  { %s196_s14 = sshll.u32 %s319_s13, 4  ;;  %s197_s14 = int_to_ptr.vmem [resolvable:$true] %s196_s14 }
 0x15c   :  { %v176_v11 = vmul.f32 %v173_v1, %v144_v62  ;;  %v177_v12 = vmul.f32 %v174_v10, %v144_v62  ;;  %s282_s15 = scalar_lea.vmem %s197_s14, 256  ;;  %p287_p2 = scmp.lt.s32.totalorder %s197_s14, %s197_s14 }
 0x15d   :  { %p283_p1 = scmp.ne.s32.totalorder %s197_s14, %s282_s15  ;;  %p288_p3 = scmp.lt.s32.totalorder %s282_s15, %s282_s15 }
 0x15e   :  { %178 = vst [vmem:[#allocation8] sm:$0xff] %v176_v11  ;;  %179 = vst [vmem:[#allocation8 + $0x8] sm:$0xff] %v177_v12 }
 0x15f   :  { %p289_p4 = por %p288_p3, %p287_p2 }
 0x161   :  { %p290_p5 = pnand %p289_p4, %p283_p1 }
 0x163   :  { %293 = shalt.err (!%p290_p5)
}
 0x164   :  { %s294_s3 = scalar_lea.hbm %s421_s2, 256 }
 0x165   :  { %p295_p6 = scmp.ne.s32.totalorder %s421_s2, %s294_s3  ;;  %p298_p7 = scmp.lt.u32.totalorder %s294_s3, %s421_s2 }
 0x167   :  { %p300_p8 = pnand %p298_p7, %p295_p6 }
 0x169   :  { %303 = shalt.err (!%p300_p8)
}
 0x16a   :  { %199 = dma.vmem_to_hbm [thread:$0]  %s197_s14, 256, %s421_s2, [#allocation4]  }
 0x16b   :  { %308 = dma.done.wait [#allocation4], 256  }
 0x16c   :  { %309 = vsyncadd [#allocation4], 4294967040 }
 0x16d   :  { %310 = dma.done.wait [#allocation6], 16  }
 0x16e   :  { %311 = vsyncadd [#allocation6], 4294967280 }
 0x16f   :  { %214 = sfence }
 0x170   :  { %215 = vsyncpa [#allocation3], 1 }
 0x171   :  { %216 = vsyncpa [#allocation4], 1 }
 0x172   :  { %217 = vsyncpa [#allocation5], 1 }
 0x173   :  { %218 = vsyncpa [#allocation6], 1 }

</bundles_post_ra>
